<compile_context>
chip_gen: v7x
topology: tpu7x:2x2x1
jax: 0.10.0
libtpu: 0.0.40
codegen_flags: <defaults>
</compile_context>

<pallas_src>
import math

import jax
import jax.numpy as jnp
from jax.experimental import pallas as pl
from jax.experimental.pallas import tpu as pltpu

N_OBS = 24          # BipedalWalker-v3 observation dim
N_ACTIONS = 4       # BipedalWalker-v3 action dim
HIDDEN = 128
K_PAD = 32          # observation dim zero-extended to 32 inside the kernel
OUT_PAD = 8         # narrow output slab width (cols >= 4 are tanh(0) = 0)
N_HIDDEN = 4        # hidden_layer_1..4 (input_layer handled separately)


def _round_up(x, m):
    return (x + m - 1) // m * m


def make_dqn_kernel(tile, n_split):
    """Builds the DQN forward kernel for a given batch tile / sub-tile split."""
    sub = tile // n_split

    def dqn_kernel(x_ref, w1_ref, wh_ref, wo_ref, b_ref, o_ref, xpad_ref):
        # x_ref   : (tile, N_OBS)          f32
        # w1_ref  : (K_PAD, HIDDEN)        bf16 (rows >= N_OBS are zero)
        # wh_ref  : (4, HIDDEN, HIDDEN)    bf16
        # wo_ref  : (HIDDEN, HIDDEN)       bf16 (cols >= N_ACTIONS are zero)
        # b_ref   : (8, HIDDEN)            f32  (rows 0..4 = b1..b5, row 5 = b_out)
        # o_ref   : (tile, OUT_PAD)        f32
        # xpad_ref: (tile, K_PAD)          f32  scratch

        # In-kernel 24 -> 32 zero-extension (replaces a wrapper-side HBM pad
        # pass over x).  Pad columns are rewritten every step so this stays
        # correct when the parallel batch axis is core-sharded (v7x).
        xpad_ref[:, :N_OBS] = x_ref[...]
        xpad_ref[:, N_OBS:] = jnp.zeros((tile, K_PAD - N_OBS), jnp.float32)

        b = b_ref[...]
        w1 = w1_ref[...]
        wo = wo_ref[...]
        b_out = b[5:6, :OUT_PAD]

        # Independent batch sub-tiles: each layer's matmuls for both halves are
        # emitted together, letting the scheduler overlap one half's VPU
        # epilogue with the other half's MXU matmul.
        hs = [xpad_ref[s * sub:(s + 1) * sub, :].astype(jnp.bfloat16)
              for s in range(n_split)]

        # input_layer + ReLU (bf16 MXU operands, f32 accumulate + epilogue).
        accs = [jnp.dot(h, w1, preferred_element_type=jnp.float32) for h in hs]
        hs = [jnp.maximum(a + b[0:1, :], 0.0).astype(jnp.bfloat16) for a in accs]

        # hidden_layer_1..4 + ReLU.
        for i in range(N_HIDDEN):
            wi = wh_ref[i]
            accs = [jnp.dot(h, wi, preferred_element_type=jnp.float32) for h in hs]
            hs = [jnp.maximum(a + b[i + 1:i + 2, :], 0.0).astype(jnp.bfloat16)
                  for a in accs]

        # output_layer + tanh: keep the known-good 128-wide MXU matmul, but
        # slice the f32 accumulator to OUT_PAD columns before the epilogue so
        # both the tanh work and the HBM writeback are 16x smaller.
        for s in range(n_split):
            acc = jnp.dot(hs[s], wo, preferred_element_type=jnp.float32)
            o_ref[s * sub:(s + 1) * sub, :] = jnp.tanh(acc[:, :OUT_PAD] + b_out)

    return dqn_kernel


def dqn_forward(x, w1, wh, wo, b, *, tile_b=1024):
    """x: [B, N_OBS] float32. Returns [B, N_ACTIONS] float32."""
    B = x.shape[0]

    # Only pad the batch in the rare non-multiple-of-8 case (tiny, cheap).
    B_pad = _round_up(max(B, 1), 8)
    if B_pad != B:
        x = jnp.pad(x, ((0, B_pad - B), (0, 0)))

    # Tile selection:
    #  * small batches: one tile covering the whole batch (grid-step overhead
    #    dominates at this size).
    #  * larger batches: up to tile_b rows per step, but always >= 2 grid
    #    steps so the "parallel" axis can use both TensorCores on v7x.
    # Ragged final tiles are handled by Pallas boundary masking.
    if B_pad <= 256:
        tile = B_pad
    else:
        tile = min(tile_b, _round_up(pl.cdiv(B_pad, 2), 8))
    grid = (pl.cdiv(B_pad, tile),)

    # Interleave 2 independent sub-tiles per step when the tile is big enough.
    n_split = 2 if (tile >= 16 and tile % 16 == 0) else 1

    out = pl.pallas_call(
        make_dqn_kernel(tile, n_split),
        out_shape=jax.ShapeDtypeStruct((B_pad, OUT_PAD), jnp.float32),
        grid=grid,
        in_specs=[
            pl.BlockSpec((tile, N_OBS), lambda i: (i, 0)),             # x tile
            pl.BlockSpec((K_PAD, HIDDEN), lambda i: (0, 0)),           # w1 (resident)
            pl.BlockSpec((N_HIDDEN, HIDDEN, HIDDEN), lambda i: (0, 0, 0)),
            pl.BlockSpec((HIDDEN, HIDDEN), lambda i: (0, 0)),          # wo (padded)
            pl.BlockSpec((8, HIDDEN), lambda i: (0, 0)),               # packed biases
        ],
        out_specs=pl.BlockSpec((tile, OUT_PAD), lambda i: (i, 0)),
        scratch_shapes=[pltpu.VMEM((tile, K_PAD), jnp.float32)],
        compiler_params=pltpu.CompilerParams(
            dimension_semantics=("parallel",),   # shard batch grid on v7x 2-TC
        ),
    )(x, w1, wh, wo, b)

    return out[:B, :N_ACTIONS]


def init_params(key):
    """PyTorch nn.Linear-style init; weights stored as [in, out], packed."""
    dims = [(N_OBS, HIDDEN)] + [(HIDDEN, HIDDEN)] * N_HIDDEN + [(HIDDEN, N_ACTIONS)]
    Ws, bs = [], []
    for fan_in, fan_out in dims:
        key, kw, kb = jax.random.split(key, 3)
        bound = 1.0 / math.sqrt(fan_in)
        Ws.append(jax.random.uniform(kw, (fan_in, fan_out), jnp.float32,
                                     -bound, bound))
        bs.append(jax.random.uniform(kb, (fan_out,), jnp.float32,
                                     -bound, bound))

    # Pack / pad, cast weights to bf16 for the MXU.
    w1 = jnp.zeros((K_PAD, HIDDEN), jnp.float32).at[:N_OBS].set(Ws[0])
    w1 = w1.astype(jnp.bfloat16)
    wh = jnp.stack(Ws[1:5], axis=0).astype(jnp.bfloat16)            # (4,128,128)
    wo = jnp.zeros((HIDDEN, HIDDEN), jnp.float32).at[:, :N_ACTIONS].set(Ws[5])
    wo = wo.astype(jnp.bfloat16)

    b = jnp.zeros((8, HIDDEN), jnp.float32)
    for i in range(5):
        b = b.at[i, :].set(bs[i])
    b = b.at[5, :N_ACTIONS].set(bs[5])
    return w1, wh, wo, b


def reference_forward(x, w1, wh, wo, b):
    """Pure-JAX reference with identical numerics (bf16 MXU inputs, f32 acc)."""
    h = jnp.pad(x, ((0, 0), (0, K_PAD - x.shape[1])))
    h = jnp.maximum(
        jnp.dot(h.astype(jnp.bfloat16), w1, preferred_element_type=jnp.float32)
        + b[0:1, :], 0.0)
    for i in range(N_HIDDEN):
        h = jnp.maximum(
            jnp.dot(h.astype(jnp.bfloat16), wh[i],
                    preferred_element_type=jnp.float32) + b[i + 1:i + 2, :], 0.0)
    out = jnp.tanh(
        jnp.dot(h.astype(jnp.bfloat16), wo, preferred_element_type=jnp.float32)
        + b[5:6, :])
    return out[:, :N_ACTIONS]


if __name__ == "__main__":
    key = jax.random.PRNGKey(0)
    key, kx = jax.random.split(key)

    # Small replay-minibatch sized example.
    B = 64
    x = jax.random.normal(kx, (B, N_OBS), jnp.float32)
    w1, wh, wo, b = init_params(key)

    out = dqn_forward(x, w1, wh, wo, b)
    out = jax.block_until_ready(out)

    ref = reference_forward(x, w1, wh, wo, b)
    assert out.shape == (B, N_ACTIONS)
    err = float(jnp.max(jnp.abs(out - ref)))
    assert jnp.allclose(out, ref, atol=2e-3, rtol=2e-3), err

    print("KERNEL_OK")
</pallas_src>

<mosaic_0001>
module attributes {stable_mosaic.version = 11 : i64} {
  func.func @dqn_kernel(%arg0: i32, %arg1: memref<64x24xf32, #tpu.memory_space<vmem>>, %arg2: memref<32x128xbf16, #tpu.memory_space<vmem>>, %arg3: memref<4x128x128xbf16, #tpu.memory_space<vmem>>, %arg4: memref<128x128xbf16, #tpu.memory_space<vmem>>, %arg5: memref<8x128xf32, #tpu.memory_space<vmem>>, %arg6: memref<64x8xf32, #tpu.memory_space<vmem>>, %arg7: memref<64x32xf32, #tpu.memory_space<vmem>>) attributes {dimension_semantics = [#tpu.dimension_semantics<parallel>], iteration_bounds = array<i64: 1>, scalar_prefetch = 0 : i64, scratch_operands = 1 : i64, tpu.core_type = #tpu.core_type<tc>, window_params = [{transform_indices = @transform_0, window_bounds = array<i64: 64, 24>}, {pipeline_mode = #tpu.pipeline_mode<synchronous>, transform_indices = @transform_1, window_bounds = array<i64: 32, 128>}, {pipeline_mode = #tpu.pipeline_mode<synchronous>, transform_indices = @transform_2, window_bounds = array<i64: 4, 128, 128>}, {pipeline_mode = #tpu.pipeline_mode<synchronous>, transform_indices = @transform_3, window_bounds = array<i64: 128, 128>}, {pipeline_mode = #tpu.pipeline_mode<synchronous>, transform_indices = @transform_4, window_bounds = array<i64: 8, 128>}, {transform_indices = @transform_5, window_bounds = array<i64: 64, 8>}]} {
    %c0 = arith.constant 0 : index
    %c0_0 = arith.constant 0 : index
    %0 = vector.load %arg1[%c0, %c0_0] : memref<64x24xf32, #tpu.memory_space<vmem>>, vector<64x24xf32>
    %c0_1 = arith.constant 0 : index
    %c0_2 = arith.constant 0 : index
    %1 = vector.load %arg7[%c0_1, %c0_2] : memref<64x32xf32, #tpu.memory_space<vmem>>, vector<64x24xf32>
    tpu.vector_store %arg7[%c0_1, %c0_2], %0 {strides = array<i32>} : memref<64x32xf32, #tpu.memory_space<vmem>>, vector<64x24xf32>,
    %cst = arith.constant 0.000000e+00 : f32
    %2 = vector.broadcast %cst : f32 to vector<64x8xf32>
    %c0_3 = arith.constant 0 : index
    %c24 = arith.constant 24 : index
    %3 = vector.load %arg7[%c0_3, %c24] : memref<64x32xf32, #tpu.memory_space<vmem>>, vector<64x8xf32>
    tpu.vector_store %arg7[%c0_3, %c24], %2 {strides = array<i32>} : memref<64x32xf32, #tpu.memory_space<vmem>>, vector<64x8xf32>,
    %c0_4 = arith.constant 0 : index
    %c0_5 = arith.constant 0 : index
    %4 = vector.load %arg5[%c0_4, %c0_5] : memref<8x128xf32, #tpu.memory_space<vmem>>, vector<8x128xf32>
    %c0_6 = arith.constant 0 : index
    %c0_7 = arith.constant 0 : index
    %5 = vector.load %arg2[%c0_6, %c0_7] : memref<32x128xbf16, #tpu.memory_space<vmem>>, vector<32x128xbf16>
    %c0_8 = arith.constant 0 : index
    %c0_9 = arith.constant 0 : index
    %6 = vector.load %arg4[%c0_8, %c0_9] : memref<128x128xbf16, #tpu.memory_space<vmem>>, vector<128x128xbf16>
    %7 = vector.extract_strided_slice %4 {offsets = [5, 0], sizes = [1, 8], strides = [1, 1]} : vector<8x128xf32> to vector<1x8xf32>
    %c0_10 = arith.constant 0 : index
    %c0_11 = arith.constant 0 : index
    %8 = vector.load %arg7[%c0_10, %c0_11] : memref<64x32xf32, #tpu.memory_space<vmem>>, vector<32x32xf32>
    %9 = arith.truncf %8 : vector<32x32xf32> to vector<32x32xbf16>
    %c32 = arith.constant 32 : index
    %c0_12 = arith.constant 0 : index
    %10 = vector.load %arg7[%c32, %c0_12] : memref<64x32xf32, #tpu.memory_space<vmem>>, vector<32x32xf32>
    %11 = arith.truncf %10 : vector<32x32xf32> to vector<32x32xbf16>
    %cst_13 = arith.constant dense<0.000000e+00> : vector<32x128xf32>
    %12 = tpu.matmul %9, %5, %cst_13 {dimension_numbers = #tpu.dot_dimension_numbers<[1], [0], [0], [1], [0, 0, 1, 1], [], []>} : vector<32x32xbf16>, vector<32x128xbf16>, vector<32x128xf32> -> vector<32x128xf32>
    %cst_14 = arith.constant dense<0.000000e+00> : vector<32x128xf32>
    %13 = tpu.matmul %11, %5, %cst_14 {dimension_numbers = #tpu.dot_dimension_numbers<[1], [0], [0], [1], [0, 0, 1, 1], [], []>} : vector<32x32xbf16>, vector<32x128xbf16>, vector<32x128xf32> -> vector<32x128xf32>
    %14 = vector.extract_strided_slice %4 {offsets = [0, 0], sizes = [1, 128], strides = [1, 1]} : vector<8x128xf32> to vector<1x128xf32>
    %15 = vector.broadcast %14 : vector<1x128xf32> to vector<32x128xf32>
    %16 = arith.addf %12, %15 : vector<32x128xf32>
    %cst_15 = arith.constant 0.000000e+00 : f32
    %17 = vector.broadcast %cst_15 : f32 to vector<32x128xf32>
    %18 = arith.maximumf %16, %17 : vector<32x128xf32>
    %19 = arith.truncf %18 : vector<32x128xf32> to vector<32x128xbf16>
    %20 = vector.extract_strided_slice %4 {offsets = [0, 0], sizes = [1, 128], strides = [1, 1]} : vector<8x128xf32> to vector<1x128xf32>
    %21 = vector.broadcast %20 : vector<1x128xf32> to vector<32x128xf32>
    %22 = arith.addf %13, %21 : vector<32x128xf32>
    %cst_16 = arith.constant 0.000000e+00 : f32
    %23 = vector.broadcast %cst_16 : f32 to vector<32x128xf32>
    %24 = arith.maximumf %22, %23 : vector<32x128xf32>
    %25 = arith.truncf %24 : vector<32x128xf32> to vector<32x128xbf16>
    %c0_17 = arith.constant 0 : index
    %c0_18 = arith.constant 0 : index
    %c0_19 = arith.constant 0 : index
    %26 = vector.load %arg3[%c0_17, %c0_18, %c0_19] : memref<4x128x128xbf16, #tpu.memory_space<vmem>>, vector<1x128x128xbf16>
    %27 = vector.shape_cast %26 : vector<1x128x128xbf16> to vector<128x128xbf16>
    %cst_20 = arith.constant dense<0.000000e+00> : vector<32x128xf32>
    %28 = tpu.matmul %19, %27, %cst_20 {dimension_numbers = #tpu.dot_dimension_numbers<[1], [0], [0], [1], [0, 0, 1, 1], [], []>} : vector<32x128xbf16>, vector<128x128xbf16>, vector<32x128xf32> -> vector<32x128xf32>
    %cst_21 = arith.constant dense<0.000000e+00> : vector<32x128xf32>
    %29 = tpu.matmul %25, %27, %cst_21 {dimension_numbers = #tpu.dot_dimension_numbers<[1], [0], [0], [1], [0, 0, 1, 1], [], []>} : vector<32x128xbf16>, vector<128x128xbf16>, vector<32x128xf32> -> vector<32x128xf32>
    %30 = vector.extract_strided_slice %4 {offsets = [1, 0], sizes = [1, 128], strides = [1, 1]} : vector<8x128xf32> to vector<1x128xf32>
    %31 = vector.broadcast %30 : vector<1x128xf32> to vector<32x128xf32>
    %32 = arith.addf %28, %31 : vector<32x128xf32>
    %cst_22 = arith.constant 0.000000e+00 : f32
    %33 = vector.broadcast %cst_22 : f32 to vector<32x128xf32>
    %34 = arith.maximumf %32, %33 : vector<32x128xf32>
    %35 = arith.truncf %34 : vector<32x128xf32> to vector<32x128xbf16>
    %36 = vector.extract_strided_slice %4 {offsets = [1, 0], sizes = [1, 128], strides = [1, 1]} : vector<8x128xf32> to vector<1x128xf32>
    %37 = vector.broadcast %36 : vector<1x128xf32> to vector<32x128xf32>
    %38 = arith.addf %29, %37 : vector<32x128xf32>
    %cst_23 = arith.constant 0.000000e+00 : f32
    %39 = vector.broadcast %cst_23 : f32 to vector<32x128xf32>
    %40 = arith.maximumf %38, %39 : vector<32x128xf32>
    %41 = arith.truncf %40 : vector<32x128xf32> to vector<32x128xbf16>
    %c1 = arith.constant 1 : index
    %c0_24 = arith.constant 0 : index
    %c0_25 = arith.constant 0 : index
    %42 = vector.load %arg3[%c1, %c0_24, %c0_25] : memref<4x128x128xbf16, #tpu.memory_space<vmem>>, vector<1x128x128xbf16>
    %43 = vector.shape_cast %42 : vector<1x128x128xbf16> to vector<128x128xbf16>
    %cst_26 = arith.constant dense<0.000000e+00> : vector<32x128xf32>
    %44 = tpu.matmul %35, %43, %cst_26 {dimension_numbers = #tpu.dot_dimension_numbers<[1], [0], [0], [1], [0, 0, 1, 1], [], []>} : vector<32x128xbf16>, vector<128x128xbf16>, vector<32x128xf32> -> vector<32x128xf32>
    %cst_27 = arith.constant dense<0.000000e+00> : vector<32x128xf32>
    %45 = tpu.matmul %41, %43, %cst_27 {dimension_numbers = #tpu.dot_dimension_numbers<[1], [0], [0], [1], [0, 0, 1, 1], [], []>} : vector<32x128xbf16>, vector<128x128xbf16>, vector<32x128xf32> -> vector<32x128xf32>
    %46 = vector.extract_strided_slice %4 {offsets = [2, 0], sizes = [1, 128], strides = [1, 1]} : vector<8x128xf32> to vector<1x128xf32>
    %47 = vector.broadcast %46 : vector<1x128xf32> to vector<32x128xf32>
    %48 = arith.addf %44, %47 : vector<32x128xf32>
    %cst_28 = arith.constant 0.000000e+00 : f32
    %49 = vector.broadcast %cst_28 : f32 to vector<32x128xf32>
    %50 = arith.maximumf %48, %49 : vector<32x128xf32>
    %51 = arith.truncf %50 : vector<32x128xf32> to vector<32x128xbf16>
    %52 = vector.extract_strided_slice %4 {offsets = [2, 0], sizes = [1, 128], strides = [1, 1]} : vector<8x128xf32> to vector<1x128xf32>
    %53 = vector.broadcast %52 : vector<1x128xf32> to vector<32x128xf32>
    %54 = arith.addf %45, %53 : vector<32x128xf32>
    %cst_29 = arith.constant 0.000000e+00 : f32
    %55 = vector.broadcast %cst_29 : f32 to vector<32x128xf32>
    %56 = arith.maximumf %54, %55 : vector<32x128xf32>
    %57 = arith.truncf %56 : vector<32x128xf32> to vector<32x128xbf16>
    %c2 = arith.constant 2 : index
    %c0_30 = arith.constant 0 : index
    %c0_31 = arith.constant 0 : index
    %58 = vector.load %arg3[%c2, %c0_30, %c0_31] : memref<4x128x128xbf16, #tpu.memory_space<vmem>>, vector<1x128x128xbf16>
    %59 = vector.shape_cast %58 : vector<1x128x128xbf16> to vector<128x128xbf16>
    %cst_32 = arith.constant dense<0.000000e+00> : vector<32x128xf32>
    %60 = tpu.matmul %51, %59, %cst_32 {dimension_numbers = #tpu.dot_dimension_numbers<[1], [0], [0], [1], [0, 0, 1, 1], [], []>} : vector<32x128xbf16>, vector<128x128xbf16>, vector<32x128xf32> -> vector<32x128xf32>
    %cst_33 = arith.constant dense<0.000000e+00> : vector<32x128xf32>
    %61 = tpu.matmul %57, %59, %cst_33 {dimension_numbers = #tpu.dot_dimension_numbers<[1], [0], [0], [1], [0, 0, 1, 1], [], []>} : vector<32x128xbf16>, vector<128x128xbf16>, vector<32x128xf32> -> vector<32x128xf32>
    %62 = vector.extract_strided_slice %4 {offsets = [3, 0], sizes = [1, 128], strides = [1, 1]} : vector<8x128xf32> to vector<1x128xf32>
    %63 = vector.broadcast %62 : vector<1x128xf32> to vector<32x128xf32>
    %64 = arith.addf %60, %63 : vector<32x128xf32>
    %cst_34 = arith.constant 0.000000e+00 : f32
    %65 = vector.broadcast %cst_34 : f32 to vector<32x128xf32>
    %66 = arith.maximumf %64, %65 : vector<32x128xf32>
    %67 = arith.truncf %66 : vector<32x128xf32> to vector<32x128xbf16>
    %68 = vector.extract_strided_slice %4 {offsets = [3, 0], sizes = [1, 128], strides = [1, 1]} : vector<8x128xf32> to vector<1x128xf32>
    %69 = vector.broadcast %68 : vector<1x128xf32> to vector<32x128xf32>
    %70 = arith.addf %61, %69 : vector<32x128xf32>
    %cst_35 = arith.constant 0.000000e+00 : f32
    %71 = vector.broadcast %cst_35 : f32 to vector<32x128xf32>
    %72 = arith.maximumf %70, %71 : vector<32x128xf32>
    %73 = arith.truncf %72 : vector<32x128xf32> to vector<32x128xbf16>
    %c3 = arith.constant 3 : index
    %c0_36 = arith.constant 0 : index
    %c0_37 = arith.constant 0 : index
    %74 = vector.load %arg3[%c3, %c0_36, %c0_37] : memref<4x128x128xbf16, #tpu.memory_space<vmem>>, vector<1x128x128xbf16>
    %75 = vector.shape_cast %74 : vector<1x128x128xbf16> to vector<128x128xbf16>
    %cst_38 = arith.constant dense<0.000000e+00> : vector<32x128xf32>
    %76 = tpu.matmul %67, %75, %cst_38 {dimension_numbers = #tpu.dot_dimension_numbers<[1], [0], [0], [1], [0, 0, 1, 1], [], []>} : vector<32x128xbf16>, vector<128x128xbf16>, vector<32x128xf32> -> vector<32x128xf32>
    %cst_39 = arith.constant dense<0.000000e+00> : vector<32x128xf32>
    %77 = tpu.matmul %73, %75, %cst_39 {dimension_numbers = #tpu.dot_dimension_numbers<[1], [0], [0], [1], [0, 0, 1, 1], [], []>} : vector<32x128xbf16>, vector<128x128xbf16>, vector<32x128xf32> -> vector<32x128xf32>
    %78 = vector.extract_strided_slice %4 {offsets = [4, 0], sizes = [1, 128], strides = [1, 1]} : vector<8x128xf32> to vector<1x128xf32>
    %79 = vector.broadcast %78 : vector<1x128xf32> to vector<32x128xf32>
    %80 = arith.addf %76, %79 : vector<32x128xf32>
    %cst_40 = arith.constant 0.000000e+00 : f32
    %81 = vector.broadcast %cst_40 : f32 to vector<32x128xf32>
    %82 = arith.maximumf %80, %81 : vector<32x128xf32>
    %83 = arith.truncf %82 : vector<32x128xf32> to vector<32x128xbf16>
    %84 = vector.extract_strided_slice %4 {offsets = [4, 0], sizes = [1, 128], strides = [1, 1]} : vector<8x128xf32> to vector<1x128xf32>
    %85 = vector.broadcast %84 : vector<1x128xf32> to vector<32x128xf32>
    %86 = arith.addf %77, %85 : vector<32x128xf32>
    %cst_41 = arith.constant 0.000000e+00 : f32
    %87 = vector.broadcast %cst_41 : f32 to vector<32x128xf32>
    %88 = arith.maximumf %86, %87 : vector<32x128xf32>
    %89 = arith.truncf %88 : vector<32x128xf32> to vector<32x128xbf16>
    %cst_42 = arith.constant dense<0.000000e+00> : vector<32x128xf32>
    %90 = tpu.matmul %83, %6, %cst_42 {dimension_numbers = #tpu.dot_dimension_numbers<[1], [0], [0], [1], [0, 0, 1, 1], [], []>} : vector<32x128xbf16>, vector<128x128xbf16>, vector<32x128xf32> -> vector<32x128xf32>
    %91 = vector.extract_strided_slice %90 {offsets = [0, 0], sizes = [32, 8], strides = [1, 1]} : vector<32x128xf32> to vector<32x8xf32>
    %92 = vector.broadcast %7 : vector<1x8xf32> to vector<32x8xf32>
    %93 = arith.addf %91, %92 : vector<32x8xf32>
    %94 = math.tanh %93 : vector<32x8xf32>
    %c0_43 = arith.constant 0 : index
    %c0_44 = arith.constant 0 : index
    %95 = vector.load %arg6[%c0_43, %c0_44] : memref<64x8xf32, #tpu.memory_space<vmem>>, vector<32x8xf32>
    tpu.vector_store %arg6[%c0_43, %c0_44], %94 {strides = array<i32>} : memref<64x8xf32, #tpu.memory_space<vmem>>, vector<32x8xf32>,
    %cst_45 = arith.constant dense<0.000000e+00> : vector<32x128xf32>
    %96 = tpu.matmul %89, %6, %cst_45 {dimension_numbers = #tpu.dot_dimension_numbers<[1], [0], [0], [1], [0, 0, 1, 1], [], []>} : vector<32x128xbf16>, vector<128x128xbf16>, vector<32x128xf32> -> vector<32x128xf32>
    %97 = vector.extract_strided_slice %96 {offsets = [0, 0], sizes = [32, 8], strides = [1, 1]} : vector<32x128xf32> to vector<32x8xf32>
    %98 = vector.broadcast %7 : vector<1x8xf32> to vector<32x8xf32>
    %99 = arith.addf %97, %98 : vector<32x8xf32>
    %100 = math.tanh %99 : vector<32x8xf32>
    %c32_46 = arith.constant 32 : index
    %c0_47 = arith.constant 0 : index
    %101 = vector.load %arg6[%c32_46, %c0_47] : memref<64x8xf32, #tpu.memory_space<vmem>>, vector<32x8xf32>
    tpu.vector_store %arg6[%c32_46, %c0_47], %100 {strides = array<i32>} : memref<64x8xf32, #tpu.memory_space<vmem>>, vector<32x8xf32>,
    return
  }
  func.func @transform_0(%arg0: i32) -> (i32, i32) {
    %c0_i32 = arith.constant 0 : i32
    %c0_i32_0 = arith.constant 0 : i32
    return %arg0, %c0_i32 : i32, i32
  }
  func.func @transform_1(%arg0: i32) -> (i32, i32) {
    %c0_i32 = arith.constant 0 : i32
    %c0_i32_0 = arith.constant 0 : i32
    %c0_i32_1 = arith.constant 0 : i32
    return %c0_i32, %c0_i32_0 : i32, i32
  }
  func.func @transform_2(%arg0: i32) -> (i32, i32, i32) {
    %c0_i32 = arith.constant 0 : i32
    %c0_i32_0 = arith.constant 0 : i32
    %c0_i32_1 = arith.constant 0 : i32
    %c0_i32_2 = arith.constant 0 : i32
    return %c0_i32, %c0_i32_0, %c0_i32_1 : i32, i32, i32
  }
  func.func @transform_3(%arg0: i32) -> (i32, i32) {
    %c0_i32 = arith.constant 0 : i32
    %c0_i32_0 = arith.constant 0 : i32
    %c0_i32_1 = arith.constant 0 : i32
    return %c0_i32, %c0_i32_0 : i32, i32
  }
  func.func @transform_4(%arg0: i32) -> (i32, i32) {
    %c0_i32 = arith.constant 0 : i32
    %c0_i32_0 = arith.constant 0 : i32
    %c0_i32_1 = arith.constant 0 : i32
    return %c0_i32, %c0_i32_0 : i32, i32
  }
  func.func @transform_5(%arg0: i32) -> (i32, i32) {
    %c0_i32 = arith.constant 0 : i32
    %c0_i32_0 = arith.constant 0 : i32
    return %arg0, %c0_i32 : i32, i32
  }
}

</mosaic_0001>

<bundles_post_ra>
// kernel: tpu_custom_call.1
= control target key start
LH: loop header
LB: loop body
LE: loop exit
PB: predicated region body
PF: predicated region fallthrough
CT: control target
= control target key end

     0   :  { %10 = vsyncpa [#allocation4], 0  ;;  %s1584_s18 = smov [#allocation3]   ;;  %s1755_s0 = inlined_call_operand.vmem [shape: f32[64,24], index: 0, kind: input, shape index: {}]   ;;  %s1756_s1 = inlined_call_operand.vmem [shape: bf16[32,128], index: 1, kind: input, shape index: {}]   ;;  %s1757_s2 = inlined_call_operand.hbm [shape: bf16[4,128,128], index: 2, kind: input, shape index: {}]   ;;  %s1758_s3 = inlined_call_operand.vmem [shape: bf16[128,128], index: 3, kind: input, shape index: {}]   ;;  %s1759_s4 = inlined_call_operand.vmem [shape: f32[8,128], index: 4, kind: input, shape index: {}]   ;;  %s1760_s5 = inlined_call_operand.vmem [shape: f32[64,8], index: 5, kind: output, shape index: {}]  }
   0x1   :  { %s20_s19 = sshll.u32 %s1584_s18, 4  ;;  %s1560_s22 = scalar_lea.hbm %s1757_s2, 4096  ;;  %s21_s19 = int_to_ptr.vmem [resolvable:$true] %s20_s19 }
   0x2   :  { %p1561_p0 = scmp.ne.s32.totalorder %s1757_s2, %s1560_s22  ;;  %p1564_p1 = scmp.lt.u32.totalorder %s1560_s22, %s1757_s2 }
   0x4   :  { %p1566_p2 = pnand %p1564_p1, %p1561_p0 }
   0x6   :  { %1569 = shalt.err (!%p1566_p2)
}
   0x7   :  { %s1570_s27 = scalar_lea.vmem %s21_s19, 4096  ;;  %p1575_p4 = scmp.lt.s32.totalorder %s21_s19, %s21_s19 }
   0x8   :  { %p1571_p3 = scmp.ne.s32.totalorder %s21_s19, %s1570_s27  ;;  %p1576_p5 = scmp.lt.s32.totalorder %s1570_s27, %s1570_s27 }
   0xa   :  { %p1577_p6 = por %p1576_p5, %p1575_p4 }
   0xc   :  { %p1578_p7 = pnand %p1577_p6, %p1571_p3 }
   0xe   :  { %1581 = shalt.err (!%p1578_p7)
}
   0xf   :  { %s1585_s28 = smov 64   ;;  %s1586_s29 = smov 4  }
  0x10   :  { %26 = dma.hbm_to_vmem [thread:$0]  %s1757_s2, 4096, %s21_s19, [#allocation4], %s1585_s28, %s1585_s28, %s1586_s29  }
  0x11   :  { %1582 = dma.done.wait [#allocation4], 4096  }
  0x12   :  { %1583 = vsyncadd [#allocation4], 4294963200  ;;  %vm43_vm0 = vcmask 195584   ;;  %v1502_v0 = vld [vmem:[%s1756_s1] sm:$0xff]   ;;  %vm52_vm1 = vcmask 261312   ;;  %v1503_v1 = vld [vmem:[%s1756_s1 + $0x8] sm:$0xff]   ;;  %v94_v32 = vlaneseq }
  0x13   :  { %1282 = vmatprep.subr.bf16.mxu0 %v1502_v0  ;;  %1290 = vmatprep.subr.bf16.mxu1 %v1502_v0  ;;  %v35_v2 = vld [vmem:[%s1755_s0] sm:$0xff]  ;;  %v36_v3 = vld [vmem:[%s1755_s0 + $0x8] sm:$0xff]  ;;  %v37_v6 = vld [vmem:[%s1755_s0 + $0x10] sm:$0xff]  ;;  %v1587_v8 = vmov 0.0   ;;  %vm110_vm2 = vcmask 261120   ;;  %vm1057_vm3 = vcmask 64512  }
  0x14   :  { %v39_v4 = vld [vmem:[%s1755_s0 + $0x20] sm:$0xff]  ;;  %1283 = vmatpush3.bf16.msra.mxu0 %v1502_v0  ;;  %1291 = vmatpush3.bf16.msra.mxu1 %v1502_v0  ;;  %44 = vst.msk [vmem:[#allocation2] sm:$0xff] %vm43_vm0, %v35_v2  ;;  %45 = vst.msk [vmem:[#allocation2 + $0x8] sm:$0xff] %vm43_vm0, %v36_v3  ;;  %v40_v5 = vld [vmem:[%s1755_s0 + $0x28] sm:$0xff]  ;;  %v1680_v33 = vshrl.u32 %v94_v32, 7 }
  0x15   :  { %48 = vst.msk [vmem:[#allocation2 + $0x20] sm:$0xff] %vm43_vm0, %v39_v4  ;;  %v38_v7 = vld [vmem:[%s1755_s0 + $0x18] sm:$0xff]  ;;  %1284 = vmatprep.subr.bf16.mxu0 %v1503_v1  ;;  %1292 = vmatprep.subr.bf16.mxu1 %v1503_v1  ;;  %49 = vst.msk [vmem:[#allocation2 + $0x28] sm:$0xff] %vm43_vm0, %v40_v5  ;;  %v41_v9 = vld [vmem:[%s1755_s0 + $0x30] sm:$0xff] }
  0x16   :  { %53 = vst.msk [vmem:[#allocation2] sm:$0xff] %vm52_vm1, %v1587_v8  ;;  %54 = vst.msk [vmem:[#allocation2 + $0x8] sm:$0xff] %vm52_vm1, %v1587_v8  ;;  %v42_v10 = vld [vmem:[%s1755_s0 + $0x38] sm:$0xff]  ;;  %v1504_v11 = vld [vmem:[#allocation3] sm:$0xff]   ;;  %v96_v34 = vsub.s32 0, %v1680_v33 }
  0x17   :  { %57 = vst.msk [vmem:[#allocation2 + $0x20] sm:$0xff] %vm52_vm1, %v1587_v8  ;;  %58 = vst.msk [vmem:[#allocation2 + $0x28] sm:$0xff] %vm52_vm1, %v1587_v8  ;;  %v1505_v15 = vld [vmem:[#allocation3 + $0x8] sm:$0xff]   ;;  %v1506_v25 = vld [vmem:[#allocation3 + $0x10] sm:$0xff]  }
  0x18   :  { %46 = vst.msk [vmem:[#allocation2 + $0x10] sm:$0xff] %vm43_vm0, %v37_v6  ;;  %47 = vst.msk [vmem:[#allocation2 + $0x18] sm:$0xff] %vm43_vm0, %v38_v7  ;;  %1285 = vmatpush3.bf16.msra.mxu0 %v1503_v1  ;;  %1293 = vmatpush3.bf16.msra.mxu1 %v1503_v1  ;;  %v1507_v26 = vld [vmem:[#allocation3 + $0x18] sm:$0xff]   ;;  %v1508_v27 = vld [vmem:[#allocation3 + $0x20] sm:$0xff]  }
  0x19   :  { %55 = vst.msk [vmem:[#allocation2 + $0x10] sm:$0xff] %vm52_vm1, %v1587_v8  ;;  %56 = vst.msk [vmem:[#allocation2 + $0x18] sm:$0xff] %vm52_vm1, %v1587_v8  ;;  %1298 = vmatprep.subr.bf16.mxu0 %v1504_v11  ;;  %1318 = vmatprep.subr.bf16.mxu1 %v1504_v11  ;;  %v1509_v28 = vld [vmem:[#allocation3 + $0x28] sm:$0xff]   ;;  %v1510_v29 = vld [vmem:[#allocation3 + $0x30] sm:$0xff]  }
  0x1a   :  { %50 = vst.msk [vmem:[#allocation2 + $0x30] sm:$0xff] %vm43_vm0, %v41_v9  ;;  %51 = vst.msk [vmem:[#allocation2 + $0x38] sm:$0xff] %vm43_vm0, %v42_v10  ;;  %v1511_v30 = vld [vmem:[#allocation3 + $0x38] sm:$0xff]   ;;  %v1512_v31 = vld [vmem:[#allocation3 + $0x40] sm:$0xff]   ;;  %v251_v9 = vsub.s32 1, %v1680_v33 }
  0x1b   :  { %59 = vst.msk [vmem:[#allocation2 + $0x30] sm:$0xff] %vm52_vm1, %v1587_v8  ;;  %60 = vst.msk [vmem:[#allocation2 + $0x38] sm:$0xff] %vm52_vm1, %v1587_v8  ;;  %v1686_v35 = vld [vmem:[%s1759_s4] sm:$0xff]  ;;  %v1513_v1 = vld [vmem:[#allocation3 + $0x48] sm:$0xff]  }
  0x1c   :  { %v97_v36 = vrot.slane %v1686_v35, %v96_v34  ;;  %v1514_v2 = vld [vmem:[#allocation3 + $0x50] sm:$0xff]   ;;  %v1515_v3 = vld [vmem:[#allocation3 + $0x58] sm:$0xff]   ;;  %v1516_v4 = vld [vmem:[#allocation3 + $0x60] sm:$0xff]   ;;  %v252_v10 = vrot.slane %v1686_v35, %v251_v9 }
  0x1d   :  { %v82_v12 = vld [vmem:[#allocation2] sm:$0xff]  ;;  %v83_v13 = vld [vmem:[#allocation2 + $0x8] sm:$0xff]  ;;  %v1518_v6 = vld [vmem:[#allocation3 + $0x70] sm:$0xff]  }
  0x1e   :  { %v88_v14 = vld [vmem:[#allocation2 + $0x20] sm:$0xff]  ;;  %v86_v16 = vpack.c.bf16 %v83_v13, %v82_v12  ;;  %v89_v17 = vld [vmem:[#allocation2 + $0x28] sm:$0xff]  ;;  %v1519_v7 = vld [vmem:[#allocation3 + $0x78] sm:$0xff]  }
  0x1f   :  { %v92_v20 = vpack.c.bf16 %v89_v17, %v88_v14  ;;  %v1517_v5 = vld [vmem:[#allocation3 + $0x68] sm:$0xff]   ;;  %v1520_v8 = vld [vmem:[#allocation3 + $0x80] sm:$0xff]  }
  0x20   :  { %v84_v18 = vld [vmem:[#allocation2 + $0x10] sm:$0xff]  ;;  %v85_v19 = vld [vmem:[#allocation2 + $0x18] sm:$0xff]  ;;  %1286 = vmatprep.mubr.msk.bf16.mxu0 %vm110_vm2, %v86_v16 }
  0x21   :  { %v87_v21 = vpack.c.bf16 %v85_v19, %v84_v18  ;;  %1294 = vmatprep.mubr.msk.bf16.mxu1 %vm110_vm2, %v92_v20 }
  0x22   :  { %v90_v22 = vld [vmem:[#allocation2 + $0x30] sm:$0xff]  ;;  %v91_v23 = vld [vmem:[#allocation2 + $0x38] sm:$0xff] }
  0x23   :  { %v93_v24 = vpack.c.bf16 %v91_v23, %v90_v22  ;;  %1287 = vmatmul.mubr.msk.bf16.vlgmr.msra.gmra.mrb[0].mxu0 %vm110_vm2, %v87_v21 }
  0x24   :  { %1299 = vmatpush3.bf16.msra.mxu0 %v1504_v11 }
  0x25   :  { %1295 = vmatmul.mubr.msk.bf16.vlgmr.msra.gmra.mrb[0].mxu1 %vm110_vm2, %v93_v24  ;;  %1300 = vmatprep.subr.bf16.mxu0 %v1505_v15 }
  0x26   :  { %1319 = vmatpush3.bf16.msra.mxu1 %v1504_v11 }
  0x27   :  { %1320 = vmatprep.subr.bf16.mxu1 %v1505_v15 }
  0x28   :  { %1301 = vmatpush3.bf16.msra.mxu0 %v1505_v15 }
  0x29   :  { %1302 = vmatprep.subr.bf16.mxu0 %v1506_v25 }
  0x2a   :  { %1321 = vmatpush3.bf16.msra.mxu1 %v1505_v15 }
  0x2b   :  { %1322 = vmatprep.subr.bf16.mxu1 %v1506_v25 }
  0x2c   :  { %1303 = vmatpush3.bf16.msra.mxu0 %v1506_v25 }
  0x2d   :  { %1304 = vmatprep.subr.bf16.mxu0 %v1507_v26 }
  0x2e   :  { %1323 = vmatpush3.bf16.msra.mxu1 %v1506_v25 }
  0x2f   :  { %1324 = vmatprep.subr.bf16.mxu1 %v1507_v26 }
  0x30   :  { %1305 = vmatpush3.bf16.msra.mxu0 %v1507_v26 }
  0x31   :  { %1306 = vmatprep.subr.bf16.mxu0 %v1508_v27 }
  0x32   :  { %1325 = vmatpush3.bf16.msra.mxu1 %v1507_v26 }
  0x33   :  { %1326 = vmatprep.subr.bf16.mxu1 %v1508_v27 }
  0x34   :  { %1307 = vmatpush3.bf16.msra.mxu0 %v1508_v27 }
  0x35   :  { %1308 = vmatprep.subr.bf16.mxu0 %v1509_v28 }
  0x36   :  { %1327 = vmatpush3.bf16.msra.mxu1 %v1508_v27 }
  0x37   :  { %1328 = vmatprep.subr.bf16.mxu1 %v1509_v28 }
  0x38   :  { %1309 = vmatpush3.bf16.msra.mxu0 %v1509_v28 }
  0x39   :  { %1310 = vmatprep.subr.bf16.mxu0 %v1510_v29 }
  0x3a   :  { %1329 = vmatpush3.bf16.msra.mxu1 %v1509_v28 }
  0x3b   :  { %1330 = vmatprep.subr.bf16.mxu1 %v1510_v29 }
  0x3c   :  { %1311 = vmatpush3.bf16.msra.mxu0 %v1510_v29 }
  0x3d   :  { %1312 = vmatprep.subr.bf16.mxu0 %v1511_v30 }
  0x3e   :  { %1331 = vmatpush3.bf16.msra.mxu1 %v1510_v29 }
  0x3f   :  { %1332 = vmatprep.subr.bf16.mxu1 %v1511_v30 }
  0x40   :  { %1313 = vmatpush3.bf16.msra.mxu0 %v1511_v30 }
  0x41   :  { %1338 = vmatprep.subr.bf16.mxu0 %v1512_v31 }
  0x42   :  { %1333 = vmatpush3.bf16.msra.mxu1 %v1511_v30 }
  0x43   :  { %1358 = vmatprep.subr.bf16.mxu1 %v1512_v31 }
  0xf6   :  { %v1288_v37 = vpop.f32.mrb[0].mxu0 }
  0xf7   :  { %v160_v38 = vadd.f32 %v1288_v37, %v97_v36  ;;  %v151_v40 = vpop.f32.mrb[1].mxu0 }
  0xf8   :  { %v1296_v39 = vpop.f32.mrb[0].mxu1  ;;  %v152_v42 = vadd.f32 %v151_v40, %v97_v36  ;;  %v1289_v44 = vpop.f32.mrb[2].mxu0 }
  0xf9   :  { %v221_v41 = vadd.f32 %v1296_v39, %v97_v36  ;;  %v212_v43 = vpop.f32.mrb[1].mxu1  ;;  %v163_v46 = vadd.f32 %v1289_v44, %v97_v36  ;;  %v154_v48 = vpop.f32.mrb[3].mxu0  ;;  %v168_v52 = vmax.f32 %v160_v38, 0.0  ;;  %v1524_v44 = vld [vmem:[#allocation3 + $0xa0] sm:$0xff]  }
  0xfa   :  { %v213_v45 = vadd.f32 %v212_v43, %v97_v36  ;;  %v1297_v47 = vpop.f32.mrb[2].mxu1  ;;  %v155_v50 = vadd.f32 %v154_v48, %v97_v36  ;;  %v166_v56 = vmax.f32 %v152_v42, 0.0  ;;  %v1522_v42 = vld [vmem:[#allocation3 + $0x90] sm:$0xff]   ;;  %v1523_v43 = vld [vmem:[#allocation3 + $0x98] sm:$0xff]   ;;  %v1528_v48 = vld [vmem:[#allocation3 + $0xc0] sm:$0xff]  }
  0xfb   :  { %v224_v49 = vadd.f32 %v1297_v47, %v97_v36  ;;  %v215_v51 = vpop.f32.mrb[3].mxu1  ;;  %v169_v53 = vmax.f32 %v163_v46, 0.0  ;;  %v229_v55 = vmax.f32 %v221_v41, 0.0  ;;  %v1521_v41 = vld [vmem:[#allocation3 + $0x88] sm:$0xff]   ;;  %v1526_v46 = vld [vmem:[#allocation3 + $0xb0] sm:$0xff]   ;;  %v1527_v47 = vld [vmem:[#allocation3 + $0xb8] sm:$0xff]  }
  0xfc   :  { %v216_v54 = vadd.f32 %v215_v51, %v97_v36  ;;  %v167_v58 = vmax.f32 %v155_v50, 0.0  ;;  %v227_v59 = vmax.f32 %v213_v45, 0.0  ;;  %v1525_v45 = vld [vmem:[#allocation3 + $0xa8] sm:$0xff]  }
  0xfd   :  { %v230_v57 = vmax.f32 %v224_v49, 0.0  ;;  %v171_v60 = vpack.c.bf16 %v169_v53, %v168_v52  ;;  %v430_v49 = vsub.s32 2, %v1680_v33 }
  0xfe   :  { %v228_v61 = vmax.f32 %v216_v54, 0.0  ;;  %v170_v63 = vpack.c.bf16 %v167_v58, %v166_v56 }
  0xff   :  { %v232_v62 = vpack.c.bf16 %v230_v57, %v229_v55  ;;  %v431_v50 = vrot.slane %v1686_v35, %v430_v49 }
 0x100   :  { %v231_v0 = vpack.c.bf16 %v228_v61, %v227_v59  ;;  %1314 = vmatprep.mubr.bf16.mxu0 %v170_v63 }
 0x101   :  { %1315 = vmatmul.mubr.bf16.vlgmr.msra.gmra.mrb[4].mxu0 %v171_v60 }
 0x102   :  { %1334 = vmatprep.mubr.bf16.mxu1 %v231_v0  ;;  %1339 = vmatpush3.bf16.msra.mxu0 %v1512_v31 }
 0x103   :  { %1335 = vmatmul.mubr.bf16.vlgmr.msra.gmra.mrb[4].mxu1 %v232_v62  ;;  %1340 = vmatprep.subr.bf16.mxu0 %v1513_v1 }
 0x104   :  { %1359 = vmatpush3.bf16.msra.mxu1 %v1512_v31 }
 0x105   :  { %1360 = vmatprep.subr.bf16.mxu1 %v1513_v1 }
 0x106   :  { %1341 = vmatpush3.bf16.msra.mxu0 %v1513_v1 }
 0x107   :  { %1342 = vmatprep.subr.bf16.mxu0 %v1514_v2 }
 0x108   :  { %1361 = vmatpush3.bf16.msra.mxu1 %v1513_v1 }
 0x109   :  { %1362 = vmatprep.subr.bf16.mxu1 %v1514_v2 }
 0x10a   :  { %1343 = vmatpush3.bf16.msra.mxu0 %v1514_v2 }
 0x10b   :  { %1344 = vmatprep.subr.bf16.mxu0 %v1515_v3 }
 0x10c   :  { %1363 = vmatpush3.bf16.msra.mxu1 %v1514_v2 }
 0x10d   :  { %1364 = vmatprep.subr.bf16.mxu1 %v1515_v3 }
 0x10e   :  { %1345 = vmatpush3.bf16.msra.mxu0 %v1515_v3 }
 0x10f   :  { %1346 = vmatprep.subr.bf16.mxu0 %v1516_v4 }
 0x110   :  { %1365 = vmatpush3.bf16.msra.mxu1 %v1515_v3 }
 0x111   :  { %1366 = vmatprep.subr.bf16.mxu1 %v1516_v4 }
 0x112   :  { %1347 = vmatpush3.bf16.msra.mxu0 %v1516_v4 }
 0x113   :  { %1348 = vmatprep.subr.bf16.mxu0 %v1517_v5 }
 0x114   :  { %1367 = vmatpush3.bf16.msra.mxu1 %v1516_v4 }
 0x115   :  { %1368 = vmatprep.subr.bf16.mxu1 %v1517_v5 }
 0x116   :  { %1349 = vmatpush3.bf16.msra.mxu0 %v1517_v5 }
 0x117   :  { %1350 = vmatprep.subr.bf16.mxu0 %v1518_v6 }
 0x118   :  { %1369 = vmatpush3.bf16.msra.mxu1 %v1517_v5 }
 0x119   :  { %1370 = vmatprep.subr.bf16.mxu1 %v1518_v6 }
 0x11a   :  { %1351 = vmatpush3.bf16.msra.mxu0 %v1518_v6 }
 0x11b   :  { %1352 = vmatprep.subr.bf16.mxu0 %v1519_v7 }
 0x11c   :  { %1371 = vmatpush3.bf16.msra.mxu1 %v1518_v6 }
 0x11d   :  { %1372 = vmatprep.subr.bf16.mxu1 %v1519_v7 }
 0x11e   :  { %1353 = vmatpush3.bf16.msra.mxu0 %v1519_v7 }
 0x11f   :  { %1378 = vmatprep.subr.bf16.mxu0 %v1520_v8 }
 0x120   :  { %1373 = vmatpush3.bf16.msra.mxu1 %v1519_v7 }
 0x121   :  { %1398 = vmatprep.subr.bf16.mxu1 %v1520_v8 }
 0x1d4   :  { %v1316_v11 = vpop.f32.mrb[4].mxu0 }
 0x1d5   :  { %v344_v12 = vadd.f32 %v1316_v11, %v252_v10  ;;  %v335_v14 = vpop.f32.mrb[5].mxu0 }
 0x1d6   :  { %v1336_v13 = vpop.f32.mrb[4].mxu1  ;;  %v336_v16 = vadd.f32 %v335_v14, %v252_v10  ;;  %v1317_v18 = vpop.f32.mrb[6].mxu0 }
 0x1d7   :  { %v399_v15 = vadd.f32 %v1336_v13, %v252_v10  ;;  %v390_v17 = vpop.f32.mrb[5].mxu1  ;;  %v347_v20 = vadd.f32 %v1317_v18, %v252_v10  ;;  %v338_v22 = vpop.f32.mrb[7].mxu0  ;;  %v352_v26 = vmax.f32 %v344_v12, 0.0  ;;  %v1532_v18 = vld [vmem:[#allocation3 + $0xe0] sm:$0xff]  }
 0x1d8   :  { %v391_v19 = vadd.f32 %v390_v17, %v252_v10  ;;  %v1337_v21 = vpop.f32.mrb[6].mxu1  ;;  %v339_v24 = vadd.f32 %v338_v22, %v252_v10  ;;  %v350_v30 = vmax.f32 %v336_v16, 0.0  ;;  %v1530_v16 = vld [vmem:[#allocation3 + $0xd0] sm:$0xff]   ;;  %v1531_v17 = vld [vmem:[#allocation3 + $0xd8] sm:$0xff]   ;;  %v1536_v22 = vld [vmem:[%s1758_s3] sm:$0xff]  }
 0x1d9   :  { %v402_v23 = vadd.f32 %v1337_v21, %v252_v10  ;;  %v393_v25 = vpop.f32.mrb[7].mxu1  ;;  %v353_v27 = vmax.f32 %v347_v20, 0.0  ;;  %v407_v29 = vmax.f32 %v399_v15, 0.0  ;;  %v1529_v15 = vld [vmem:[#allocation3 + $0xc8] sm:$0xff]   ;;  %v1534_v20 = vld [vmem:[#allocation3 + $0xf0] sm:$0xff]   ;;  %v1535_v21 = vld [vmem:[#allocation3 + $0xf8] sm:$0xff]  }
 0x1da   :  { %v394_v28 = vadd.f32 %v393_v25, %v252_v10  ;;  %v351_v32 = vmax.f32 %v339_v24, 0.0  ;;  %v405_v34 = vmax.f32 %v391_v19, 0.0  ;;  %v1533_v19 = vld [vmem:[#allocation3 + $0xe8] sm:$0xff]  }
 0x1db   :  { %v408_v31 = vmax.f32 %v402_v23, 0.0  ;;  %v355_v36 = vpack.c.bf16 %v353_v27, %v352_v26  ;;  %v609_v23 = vsub.s32 3, %v1680_v33 }
 0x1dc   :  { %v406_v37 = vmax.f32 %v394_v28, 0.0  ;;  %v354_v39 = vpack.c.bf16 %v351_v32, %v350_v30 }
 0x1dd   :  { %v410_v38 = vpack.c.bf16 %v408_v31, %v407_v29  ;;  %v610_v24 = vrot.slane %v1686_v35, %v609_v23 }
 0x1de   :  { %v409_v40 = vpack.c.bf16 %v406_v37, %v405_v34  ;;  %1354 = vmatprep.mubr.bf16.mxu0 %v354_v39 }
 0x1df   :  { %1355 = vmatmul.mubr.bf16.vlgmr.msra.gmra.mrb[8].mxu0 %v355_v36 }
 0x1e0   :  { %1374 = vmatprep.mubr.bf16.mxu1 %v409_v40  ;;  %1379 = vmatpush3.bf16.msra.mxu0 %v1520_v8 }
 0x1e1   :  { %1375 = vmatmul.mubr.bf16.vlgmr.msra.gmra.mrb[8].mxu1 %v410_v38  ;;  %1380 = vmatprep.subr.bf16.mxu0 %v1521_v41 }
 0x1e2   :  { %1399 = vmatpush3.bf16.msra.mxu1 %v1520_v8 }
 0x1e3   :  { %1400 = vmatprep.subr.bf16.mxu1 %v1521_v41 }
 0x1e4   :  { %1381 = vmatpush3.bf16.msra.mxu0 %v1521_v41 }
 0x1e5   :  { %1382 = vmatprep.subr.bf16.mxu0 %v1522_v42 }
 0x1e6   :  { %1401 = vmatpush3.bf16.msra.mxu1 %v1521_v41 }
 0x1e7   :  { %1402 = vmatprep.subr.bf16.mxu1 %v1522_v42 }
 0x1e8   :  { %1383 = vmatpush3.bf16.msra.mxu0 %v1522_v42 }
 0x1e9   :  { %1384 = vmatprep.subr.bf16.mxu0 %v1523_v43 }
 0x1ea   :  { %1403 = vmatpush3.bf16.msra.mxu1 %v1522_v42 }
 0x1eb   :  { %1404 = vmatprep.subr.bf16.mxu1 %v1523_v43 }
 0x1ec   :  { %1385 = vmatpush3.bf16.msra.mxu0 %v1523_v43 }
 0x1ed   :  { %1386 = vmatprep.subr.bf16.mxu0 %v1524_v44 }
 0x1ee   :  { %1405 = vmatpush3.bf16.msra.mxu1 %v1523_v43 }
 0x1ef   :  { %1406 = vmatprep.subr.bf16.mxu1 %v1524_v44 }
 0x1f0   :  { %1387 = vmatpush3.bf16.msra.mxu0 %v1524_v44 }
 0x1f1   :  { %1388 = vmatprep.subr.bf16.mxu0 %v1525_v45 }
 0x1f2   :  { %1407 = vmatpush3.bf16.msra.mxu1 %v1524_v44 }
 0x1f3   :  { %1408 = vmatprep.subr.bf16.mxu1 %v1525_v45 }
 0x1f4   :  { %1389 = vmatpush3.bf16.msra.mxu0 %v1525_v45 }
 0x1f5   :  { %1390 = vmatprep.subr.bf16.mxu0 %v1526_v46 }
 0x1f6   :  { %1409 = vmatpush3.bf16.msra.mxu1 %v1525_v45 }
 0x1f7   :  { %1410 = vmatprep.subr.bf16.mxu1 %v1526_v46 }
 0x1f8   :  { %1391 = vmatpush3.bf16.msra.mxu0 %v1526_v46 }
 0x1f9   :  { %1392 = vmatprep.subr.bf16.mxu0 %v1527_v47 }
 0x1fa   :  { %1411 = vmatpush3.bf16.msra.mxu1 %v1526_v46 }
 0x1fb   :  { %1412 = vmatprep.subr.bf16.mxu1 %v1527_v47 }
 0x1fc   :  { %1393 = vmatpush3.bf16.msra.mxu0 %v1527_v47 }
 0x1fd   :  { %1418 = vmatprep.subr.bf16.mxu0 %v1528_v48 }
 0x1fe   :  { %1413 = vmatpush3.bf16.msra.mxu1 %v1527_v47 }
 0x1ff   :  { %1438 = vmatprep.subr.bf16.mxu1 %v1528_v48 }
 0x2b2   :  { %v1356_v51 = vpop.f32.mrb[8].mxu0 }
 0x2b3   :  { %v523_v52 = vadd.f32 %v1356_v51, %v431_v50  ;;  %v514_v54 = vpop.f32.mrb[9].mxu0 }
 0x2b4   :  { %v1376_v53 = vpop.f32.mrb[8].mxu1  ;;  %v515_v56 = vadd.f32 %v514_v54, %v431_v50  ;;  %v1357_v58 = vpop.f32.mrb[10].mxu0 }
 0x2b5   :  { %v578_v55 = vadd.f32 %v1376_v53, %v431_v50  ;;  %v569_v57 = vpop.f32.mrb[9].mxu1  ;;  %v526_v60 = vadd.f32 %v1357_v58, %v431_v50  ;;  %v517_v62 = vpop.f32.mrb[11].mxu0  ;;  %v531_v2 = vmax.f32 %v523_v52, 0.0  ;;  %v1540_v58 = vld [vmem:[%s1758_s3 + $0x20] sm:$0xff]  }
 0x2b6   :  { %v570_v59 = vadd.f32 %v569_v57, %v431_v50  ;;  %v1377_v61 = vpop.f32.mrb[10].mxu1  ;;  %v518_v0 = vadd.f32 %v517_v62, %v431_v50  ;;  %v529_v6 = vmax.f32 %v515_v56, 0.0  ;;  %v1538_v56 = vld [vmem:[%s1758_s3 + $0x10] sm:$0xff]   ;;  %v1539_v57 = vld [vmem:[%s1758_s3 + $0x18] sm:$0xff]   ;;  %v788_v62 = vsub.s32 4, %v1680_v33 }
 0x2b7   :  { %v581_v63 = vadd.f32 %v1377_v61, %v431_v50  ;;  %v572_v1 = vpop.f32.mrb[11].mxu1  ;;  %v532_v3 = vmax.f32 %v526_v60, 0.0  ;;  %v586_v5 = vmax.f32 %v578_v55, 0.0  ;;  %v1537_v55 = vld [vmem:[%s1758_s3 + $0x8] sm:$0xff]   ;;  %v1542_v60 = vld [vmem:[%s1758_s3 + $0x30] sm:$0xff]   ;;  %v1543_v61 = vld [vmem:[%s1758_s3 + $0x38] sm:$0xff]  }
 0x2b8   :  { %v573_v4 = vadd.f32 %v572_v1, %v431_v50  ;;  %v530_v8 = vmax.f32 %v518_v0, 0.0  ;;  %v584_v9 = vmax.f32 %v570_v59, 0.0  ;;  %v1541_v59 = vld [vmem:[%s1758_s3 + $0x28] sm:$0xff]  }
 0x2b9   :  { %v587_v7 = vmax.f32 %v581_v63, 0.0  ;;  %v534_v10 = vpack.c.bf16 %v532_v3, %v531_v2  ;;  %v789_v63 = vrot.slane %v1686_v35, %v788_v62 }
 0x2ba   :  { %v585_v11 = vmax.f32 %v573_v4, 0.0  ;;  %v533_v13 = vpack.c.bf16 %v530_v8, %v529_v6 }
 0x2bb   :  { %v589_v12 = vpack.c.bf16 %v587_v7, %v586_v5 }
 0x2bc   :  { %v588_v14 = vpack.c.bf16 %v585_v11, %v584_v9  ;;  %1394 = vmatprep.mubr.bf16.mxu0 %v533_v13 }
 0x2bd   :  { %1395 = vmatmul.mubr.bf16.vlgmr.msra.gmra.mrb[12].mxu0 %v534_v10 }
 0x2be   :  { %1414 = vmatprep.mubr.bf16.mxu1 %v588_v14  ;;  %1419 = vmatpush3.bf16.msra.mxu0 %v1528_v48 }
 0x2bf   :  { %1415 = vmatmul.mubr.bf16.vlgmr.msra.gmra.mrb[12].mxu1 %v589_v12  ;;  %1420 = vmatprep.subr.bf16.mxu0 %v1529_v15 }
 0x2c0   :  { %1439 = vmatpush3.bf16.msra.mxu1 %v1528_v48 }
 0x2c1   :  { %1440 = vmatprep.subr.bf16.mxu1 %v1529_v15 }
 0x2c2   :  { %1421 = vmatpush3.bf16.msra.mxu0 %v1529_v15 }
 0x2c3   :  { %1422 = vmatprep.subr.bf16.mxu0 %v1530_v16 }
 0x2c4   :  { %1441 = vmatpush3.bf16.msra.mxu1 %v1529_v15 }
 0x2c5   :  { %1442 = vmatprep.subr.bf16.mxu1 %v1530_v16 }
 0x2c6   :  { %1423 = vmatpush3.bf16.msra.mxu0 %v1530_v16 }
 0x2c7   :  { %1424 = vmatprep.subr.bf16.mxu0 %v1531_v17 }
 0x2c8   :  { %1443 = vmatpush3.bf16.msra.mxu1 %v1530_v16 }
 0x2c9   :  { %1444 = vmatprep.subr.bf16.mxu1 %v1531_v17 }
 0x2ca   :  { %1425 = vmatpush3.bf16.msra.mxu0 %v1531_v17 }
 0x2cb   :  { %1426 = vmatprep.subr.bf16.mxu0 %v1532_v18 }
 0x2cc   :  { %1445 = vmatpush3.bf16.msra.mxu1 %v1531_v17 }
 0x2cd   :  { %1446 = vmatprep.subr.bf16.mxu1 %v1532_v18 }
 0x2ce   :  { %1427 = vmatpush3.bf16.msra.mxu0 %v1532_v18 }
 0x2cf   :  { %1428 = vmatprep.subr.bf16.mxu0 %v1533_v19 }
 0x2d0   :  { %1447 = vmatpush3.bf16.msra.mxu1 %v1532_v18 }
 0x2d1   :  { %1448 = vmatprep.subr.bf16.mxu1 %v1533_v19 }
 0x2d2   :  { %1429 = vmatpush3.bf16.msra.mxu0 %v1533_v19 }
 0x2d3   :  { %1430 = vmatprep.subr.bf16.mxu0 %v1534_v20 }
 0x2d4   :  { %1449 = vmatpush3.bf16.msra.mxu1 %v1533_v19 }
 0x2d5   :  { %1450 = vmatprep.subr.bf16.mxu1 %v1534_v20 }
 0x2d6   :  { %1431 = vmatpush3.bf16.msra.mxu0 %v1534_v20 }
 0x2d7   :  { %1432 = vmatprep.subr.bf16.mxu0 %v1535_v21 }
 0x2d8   :  { %1451 = vmatpush3.bf16.msra.mxu1 %v1534_v20 }
 0x2d9   :  { %1452 = vmatprep.subr.bf16.mxu1 %v1535_v21 }
 0x2da   :  { %1433 = vmatpush3.bf16.msra.mxu0 %v1535_v21 }
 0x2db   :  { %1458 = vmatprep.subr.bf16.mxu0 %v1536_v22 }
 0x2dc   :  { %1453 = vmatpush3.bf16.msra.mxu1 %v1535_v21 }
 0x2dd   :  { %1478 = vmatprep.subr.bf16.mxu1 %v1536_v22 }
 0x390   :  { %v1396_v25 = vpop.f32.mrb[12].mxu0 }
 0x391   :  { %v702_v26 = vadd.f32 %v1396_v25, %v610_v24  ;;  %v693_v28 = vpop.f32.mrb[13].mxu0 }
 0x392   :  { %v1416_v27 = vpop.f32.mrb[12].mxu1  ;;  %v694_v30 = vadd.f32 %v693_v28, %v610_v24  ;;  %v1397_v32 = vpop.f32.mrb[14].mxu0  ;;  %v1047_v28 = vsub.s32 5, %v1680_v33 }
 0x393   :  { %v757_v29 = vadd.f32 %v1416_v27, %v610_v24  ;;  %v748_v31 = vpop.f32.mrb[13].mxu1  ;;  %v705_v36 = vadd.f32 %v1397_v32, %v610_v24  ;;  %v696_v38 = vpop.f32.mrb[15].mxu0  ;;  %v710_v42 = vmax.f32 %v702_v26, 0.0 }
 0x394   :  { %v749_v34 = vadd.f32 %v748_v31, %v610_v24  ;;  %v1417_v37 = vpop.f32.mrb[14].mxu1  ;;  %v697_v40 = vadd.f32 %v696_v38, %v610_v24  ;;  %v708_v46 = vmax.f32 %v694_v30, 0.0 }
 0x395   :  { %v760_v39 = vadd.f32 %v1417_v37, %v610_v24  ;;  %v751_v41 = vpop.f32.mrb[15].mxu1  ;;  %v711_v43 = vmax.f32 %v705_v36, 0.0  ;;  %v765_v45 = vmax.f32 %v757_v29, 0.0  ;;  %v1048_v29 = vrot.slane %v1686_v35, %v1047_v28 }
 0x396   :  { %v752_v44 = vadd.f32 %v751_v41, %v610_v24  ;;  %v709_v48 = vmax.f32 %v697_v40, 0.0  ;;  %v763_v49 = vmax.f32 %v749_v34, 0.0 }
 0x397   :  { %v766_v47 = vmax.f32 %v760_v39, 0.0  ;;  %v713_v50 = vpack.c.bf16 %v711_v43, %v710_v42 }
 0x398   :  { %v764_v51 = vmax.f32 %v752_v44, 0.0  ;;  %v712_v53 = vpack.c.bf16 %v709_v48, %v708_v46 }
 0x399   :  { %v768_v52 = vpack.c.bf16 %v766_v47, %v765_v45 }
 0x39a   :  { %v767_v54 = vpack.c.bf16 %v764_v51, %v763_v49  ;;  %1434 = vmatprep.mubr.bf16.mxu0 %v712_v53 }
 0x39b   :  { %1435 = vmatmul.mubr.bf16.vlgmr.msra.gmra.mrb[16].mxu0 %v713_v50 }
 0x39c   :  { %1454 = vmatprep.mubr.bf16.mxu1 %v767_v54  ;;  %1459 = vmatpush3.bf16.msra.mxu0 %v1536_v22 }
 0x39d   :  { %1455 = vmatmul.mubr.bf16.vlgmr.msra.gmra.mrb[16].mxu1 %v768_v52  ;;  %1460 = vmatprep.subr.bf16.mxu0 %v1537_v55 }
 0x39e   :  { %1479 = vmatpush3.bf16.msra.mxu1 %v1536_v22 }
 0x39f   :  { %1480 = vmatprep.subr.bf16.mxu1 %v1537_v55 }
 0x3a0   :  { %1461 = vmatpush3.bf16.msra.mxu0 %v1537_v55 }
 0x3a1   :  { %1462 = vmatprep.subr.bf16.mxu0 %v1538_v56 }
 0x3a2   :  { %1481 = vmatpush3.bf16.msra.mxu1 %v1537_v55 }
 0x3a3   :  { %1482 = vmatprep.subr.bf16.mxu1 %v1538_v56 }
 0x3a4   :  { %1463 = vmatpush3.bf16.msra.mxu0 %v1538_v56 }
 0x3a5   :  { %1464 = vmatprep.subr.bf16.mxu0 %v1539_v57 }
 0x3a6   :  { %1483 = vmatpush3.bf16.msra.mxu1 %v1538_v56 }
 0x3a7   :  { %1484 = vmatprep.subr.bf16.mxu1 %v1539_v57 }
 0x3a8   :  { %1465 = vmatpush3.bf16.msra.mxu0 %v1539_v57 }
 0x3a9   :  { %1466 = vmatprep.subr.bf16.mxu0 %v1540_v58 }
 0x3aa   :  { %1485 = vmatpush3.bf16.msra.mxu1 %v1539_v57 }
 0x3ab   :  { %1486 = vmatprep.subr.bf16.mxu1 %v1540_v58 }
 0x3ac   :  { %1467 = vmatpush3.bf16.msra.mxu0 %v1540_v58 }
 0x3ad   :  { %1468 = vmatprep.subr.bf16.mxu0 %v1541_v59 }
 0x3ae   :  { %1487 = vmatpush3.bf16.msra.mxu1 %v1540_v58 }
 0x3af   :  { %1488 = vmatprep.subr.bf16.mxu1 %v1541_v59 }
 0x3b0   :  { %1469 = vmatpush3.bf16.msra.mxu0 %v1541_v59 }
 0x3b1   :  { %1470 = vmatprep.subr.bf16.mxu0 %v1542_v60 }
 0x3b2   :  { %1489 = vmatpush3.bf16.msra.mxu1 %v1541_v59 }
 0x3b3   :  { %1490 = vmatprep.subr.bf16.mxu1 %v1542_v60 }
 0x3b4   :  { %1471 = vmatpush3.bf16.msra.mxu0 %v1542_v60 }
 0x3b5   :  { %1472 = vmatprep.subr.bf16.mxu0 %v1543_v61 }
 0x3b6   :  { %1491 = vmatpush3.bf16.msra.mxu1 %v1542_v60 }
 0x3b7   :  { %1492 = vmatprep.subr.bf16.mxu1 %v1543_v61 }
 0x3b8   :  { %1473 = vmatpush3.bf16.msra.mxu0 %v1543_v61 }
 0x3ba   :  { %1493 = vmatpush3.bf16.msra.mxu1 %v1543_v61 }
 0x46e   :  { %v1436_v0 = vpop.f32.mrb[16].mxu0 }
 0x46f   :  { %v881_v1 = vadd.f32 %v1436_v0, %v789_v63  ;;  %v872_v3 = vpop.f32.mrb[17].mxu0 }
 0x470   :  { %v1456_v2 = vpop.f32.mrb[16].mxu1  ;;  %v873_v5 = vadd.f32 %v872_v3, %v789_v63  ;;  %v1437_v7 = vpop.f32.mrb[18].mxu0 }
 0x471   :  { %v936_v4 = vadd.f32 %v1456_v2, %v789_v63  ;;  %v927_v6 = vpop.f32.mrb[17].mxu1  ;;  %v884_v9 = vadd.f32 %v1437_v7, %v789_v63  ;;  %v875_v11 = vpop.f32.mrb[19].mxu0  ;;  %v889_v15 = vmax.f32 %v881_v1, 0.0 }
 0x472   :  { %v928_v8 = vadd.f32 %v927_v6, %v789_v63  ;;  %v1457_v10 = vpop.f32.mrb[18].mxu1  ;;  %v876_v13 = vadd.f32 %v875_v11, %v789_v63  ;;  %v887_v19 = vmax.f32 %v873_v5, 0.0 }
 0x473   :  { %v939_v12 = vadd.f32 %v1457_v10, %v789_v63  ;;  %v930_v14 = vpop.f32.mrb[19].mxu1  ;;  %v890_v16 = vmax.f32 %v884_v9, 0.0  ;;  %v944_v18 = vmax.f32 %v936_v4, 0.0 }
 0x474   :  { %v931_v17 = vadd.f32 %v930_v14, %v789_v63  ;;  %v888_v21 = vmax.f32 %v876_v13, 0.0  ;;  %v942_v22 = vmax.f32 %v928_v8, 0.0 }
 0x475   :  { %v945_v20 = vmax.f32 %v939_v12, 0.0  ;;  %v892_v23 = vpack.c.bf16 %v890_v16, %v889_v15 }
 0x476   :  { %v943_v24 = vmax.f32 %v931_v17, 0.0  ;;  %v891_v26 = vpack.c.bf16 %v888_v21, %v887_v19 }
 0x477   :  { %v947_v25 = vpack.c.bf16 %v945_v20, %v944_v18 }
 0x478   :  { %v946_v27 = vpack.c.bf16 %v943_v24, %v942_v22  ;;  %1474 = vmatprep.mubr.bf16.mxu0 %v891_v26 }
 0x479   :  { %1475 = vmatmul.mubr.bf16.vlgmr.msra.gmra.mrb[20].mxu0 %v892_v23 }
 0x47a   :  { %1494 = vmatprep.mubr.bf16.mxu1 %v946_v27 }
 0x47b   :  { %1495 = vmatmul.mubr.bf16.vlgmr.msra.gmra.mrb[20].mxu1 %v947_v25 }
 0x54c   :  { %v1476_v30 = vpop.f32.mrb[20].mxu0 }
 0x54d   :  { %v1051_v31 = vadd.f32 %v1476_v30, %v1048_v29  ;;  %v1030_v34 = vpop.f32.mrb[21].mxu0 }
 0x54e   :  { %v1496_v32 = vpop.f32.mrb[20].mxu1  ;;  %v1049_v37 = vadd.f32 %v1048_v29, %v1030_v34  ;;  %v1477_v39 = vpop.f32.mrb[22].mxu0 }
 0x54f   :  { %v1113_v36 = vadd.f32 %v1496_v32, %v1048_v29  ;;  %v1096_v38 = vpop.f32.mrb[21].mxu1  ;;  %1544 = vtanh.f32 %v1051_v31  ;;  %v1052_v41 = vadd.f32 %v1477_v39, %v1048_v29  ;;  %v1033_v43 = vpop.f32.mrb[23].mxu0 }
 0x550   :  { %v1111_v40 = vadd.f32 %v1096_v38, %v1048_v29  ;;  %v1497_v42 = vpop.f32.mrb[22].mxu1  ;;  %v1050_v33 = vadd.f32 %v1048_v29, %v1033_v43 }
 0x551   :  { %1546 = vtanh.f32 %v1113_v36  ;;  %v1114_v44 = vadd.f32 %v1497_v42, %v1048_v29  ;;  %v1099_v45 = vpop.f32.mrb[23].mxu1 }
 0x552   :  { %1548 = vtanh.f32 %v1049_v37  ;;  %v1112_v35 = vadd.f32 %v1099_v45, %v1048_v29 }
 0x553   :  { %1550 = vtanh.f32 %v1111_v40 }
 0x554   :  { %1552 = vtanh.f32 %v1052_v41 }
 0x555   :  { %1554 = vtanh.f32 %v1114_v44 }
 0x556   :  { %1556 = vtanh.f32 %v1050_v33 }
 0x557   :  { %1558 = vtanh.f32 %v1112_v35 }
 0x559   :  { %v1545_v46 = vpop.eup %1544 }
 0x55a   :  { %1060 = vst.msk [vmem:[%s1760_s5 + $0x10] sm:$0xff] %vm1057_vm3, %v1545_v46 }
 0x55b   :  { %v1547_v47 = vpop.eup %1546 }
 0x55c   :  { %v1549_v48 = vpop.eup %1548  ;;  %1121 = vst.msk [vmem:[%s1760_s5 + $0x30] sm:$0xff] %vm1057_vm3, %v1547_v47 }
 0x55d   :  { %v1551_v49 = vpop.eup %1550  ;;  %1058 = vst.msk [vmem:[%s1760_s5] sm:$0xff] %vm1057_vm3, %v1549_v48 }
 0x55e   :  { %v1553_v50 = vpop.eup %1552  ;;  %1119 = vst.msk [vmem:[%s1760_s5 + $0x20] sm:$0xff] %vm1057_vm3, %v1551_v49 }
 0x55f   :  { %v1555_v51 = vpop.eup %1554  ;;  %1061 = vst.msk [vmem:[%s1760_s5 + $0x18] sm:$0xff] %vm1057_vm3, %v1553_v50 }
 0x560   :  { %v1557_v52 = vpop.eup %1556  ;;  %1122 = vst.msk [vmem:[%s1760_s5 + $0x38] sm:$0xff] %vm1057_vm3, %v1555_v51 }
 0x561   :  { %v1559_v53 = vpop.eup %1558  ;;  %1059 = vst.msk [vmem:[%s1760_s5 + $0x8] sm:$0xff] %vm1057_vm3, %v1557_v52 }
 0x562   :  { %1120 = vst.msk [vmem:[%s1760_s5 + $0x28] sm:$0xff] %vm1057_vm3, %v1559_v53 }
 0x563   :  { %1127 = vsyncpa [#allocation4], 1 }

</bundles_post_ra>
